<compile_context>
chip_gen: v7x
topology: tpu7x:2x2x1
jax: 0.10.0
libtpu: 0.0.40
codegen_flags: <defaults>
</compile_context>

<pallas_src>
import jax
import jax.numpy as jnp
from jax.experimental import pallas as pl
from jax.experimental.pallas import tpu as pltpu


# ---------------------------------------------------------------------------
# Parameter construction (nn.Embedding weight ~ N(0, 1)) — plain JAX glue.
# ---------------------------------------------------------------------------
def init_positional_embedding(key, d_model, max_seq_len=5000, dtype=jnp.float32):
    """Learned positional-embedding table, shape (max_seq_len, d_model)."""
    return jax.random.normal(key, (max_seq_len, d_model), dtype=dtype)


# ---------------------------------------------------------------------------
# Kernel: one (ts, D) tile of the table -> one (ts, D) output tile for a
# single batch element.  The broadcast over batch lives in the grid, so the
# body is a plain copy: no vreg pressure, no VPU work, minimal VMEM.
# ---------------------------------------------------------------------------
def _pos_embed_kernel(emb_ref, o_ref):
    o_ref[...] = emb_ref[...]
    # TODO(synk): in a real model, fuse the downstream `x + pos_emb` (and/or
    # emit bf16) here to avoid an extra full B*S*D HBM round trip.


# ---------------------------------------------------------------------------
# Per-generation VMEM budgeting.
# ---------------------------------------------------------------------------
def _vmem_capacity_bytes(default_bytes=64 << 20):
    """Physical VMEM per TensorCore (v5e/v6e 128 MiB, v7x 64 MiB)."""
    try:
        return int(pltpu.get_tpu_info().vmem_capacity_bytes)
    except Exception:
        return default_bytes  # conservative fallback: v7x per-TC size


def _choose_seq_tile(S_pad, D, itemsize, pipeline_budget_bytes, batch):
    """Largest sublane-aligned seq tile whose double-buffered input AND
    output tiles fit within `pipeline_budget_bytes`."""
    per_row = 4 * D * itemsize  # 2x-buffered (ts, D) input + 2x-buffered (ts, D) output
    ts = max(8, (pipeline_budget_bytes // per_row) // 8 * 8)
    if ts >= S_pad:
        # Whole sequence fits in one tile.  If the batch axis does not already
        # give >= 2 parallel grid steps, split the sequence so both v7x
        # TensorCores get work (harmless on single-TC v5e/v6e).
        if batch >= 2 or S_pad < 16:
            return S_pad
        return max(8, ((S_pad // 2 + 7) // 8) * 8)
    return ts


# ---------------------------------------------------------------------------
# Forward wrapper
# ---------------------------------------------------------------------------
def positional_embedding_forward(x, embedding, *, seq_tile=None):
    """x: (batch, seq_len, d_model) — only its shape is used (as in torch).
    embedding: (max_seq_len, d_model) learned table.
    Returns positional embeddings of shape (batch, seq_len, d_model)."""
    B, S, D = x.shape
    max_seq_len, D_e = embedding.shape
    assert D == D_e, f"d_model mismatch: x has {D}, table has {D_e}"
    assert S <= max_seq_len, "seq_len exceeds max_seq_len"

    itemsize = jnp.dtype(embedding.dtype).itemsize

    # Sublane-align the kernel's seq extent; any padded trailing rows are
    # sliced off afterwards.  Reads past the table end (possible only in the
    # padded tail) are masked partial blocks feeding discarded rows.
    S_pad = ((S + 7) // 8) * 8

    # Explicit VMEM limit (~75% of physical, headroom for Mosaic scratch);
    # the double-buffered in+out tiles use at most half of that limit.
    vmem_cap = _vmem_capacity_bytes()
    vmem_limit = max(16 << 20, min(vmem_cap - (8 << 20), (vmem_cap * 3) // 4))
    pipeline_budget = vmem_limit // 2

    if seq_tile is None:
        ts = _choose_seq_tile(S_pad, D, itemsize, pipeline_budget, B)
    else:
        ts = int(seq_tile)
        assert ts >= 8 and ts % 8 == 0, "seq_tile must be a multiple of 8 (>= 8)"
        ts = min(ts, S_pad)

    num_seq_tiles = pl.cdiv(S_pad, ts)
    grid = (num_seq_tiles, B)

    # NOTE: for best store efficiency keep d_model a multiple of 128
    # (lane-dense output); smaller D still works (full last dim) but lowers
    # to masked partial stores.
    out = pl.pallas_call(
        _pos_embed_kernel,
        out_shape=jax.ShapeDtypeStruct((B, S_pad, D), embedding.dtype),
        grid_spec=pltpu.PrefetchScalarGridSpec(
            num_scalar_prefetch=0,
            grid=grid,
            # Full table in (no wrapper-side slice copy); index_map touches
            # only the first num_seq_tiles blocks and is batch-invariant, so
            # each table tile is DMA'd once and reused across all B writes
            # (b is the innermost grid axis).
            in_specs=[pl.BlockSpec((ts, D), lambda i, b: (i, 0))],
            # Squeezed batch dim -> output block is (ts, D): B-times smaller
            # double-buffer than the broadcast-in-kernel formulation.
            out_specs=pl.BlockSpec((None, ts, D), lambda i, b: (b, i, 0)),
        ),
        compiler_params=pltpu.CompilerParams(
            # All grid steps are independent -> shard across both v7x
            # TensorCores; harmless on single-TC v5e/v6e.
            dimension_semantics=("parallel", "parallel"),
            vmem_limit_bytes=int(vmem_limit),
        ),
    )(embedding)

    if S_pad != S:
        out = out[:, :S, :]
    return out


# ---------------------------------------------------------------------------
# Demo / self-check
# ---------------------------------------------------------------------------
if __name__ == "__main__":
    key = jax.random.PRNGKey(0)
    k_emb, k_x = jax.random.split(key)

    # Small shapes; d_model=128 keeps the output lane-dense.
    batch, seq_len, d_model = 2, 8, 128
    max_seq_len = 64

    emb = init_positional_embedding(k_emb, d_model, max_seq_len)
    x = jax.random.normal(k_x, (batch, seq_len, d_model), dtype=jnp.float32)

    out = jax.block_until_ready(positional_embedding_forward(x, emb))
    ref = jnp.broadcast_to(emb[:seq_len][None, :, :], (batch, seq_len, d_model))
    assert out.shape == (batch, seq_len, d_model)
    assert out.dtype == emb.dtype
    assert jnp.allclose(out, ref), "mismatch vs reference"

    # Multi-tile (pipelined) path with a forced small tile.
    x2 = jax.random.normal(k_x, (4, 32, d_model), dtype=jnp.float32)
    out2 = jax.block_until_ready(
        positional_embedding_forward(x2, emb, seq_tile=8))
    ref2 = jnp.broadcast_to(emb[:32][None, :, :], (4, 32, d_model))
    assert jnp.allclose(out2, ref2), "mismatch vs reference (tiled path)"

    # Single-batch path (exercises the split-for-megacore branch).
    x3 = jax.random.normal(k_x, (1, 32, d_model), dtype=jnp.float32)
    out3 = jax.block_until_ready(positional_embedding_forward(x3, emb))
    ref3 = jnp.broadcast_to(emb[:32][None, :, :], (1, 32, d_model))
    assert jnp.allclose(out3, ref3), "mismatch vs reference (B=1 path)"

    print("KERNEL_OK")
</pallas_src>

<mosaic_0001>
module attributes {stable_mosaic.version = 11 : i64} {
  func.func @_pos_embed_kernel(%arg0: i32, %arg1: i32, %arg2: memref<8x128xf32, #tpu.memory_space<vmem>>, %arg3: memref<1x8x128xf32, #tpu.memory_space<vmem>>) attributes {dimension_semantics = [#tpu.dimension_semantics<parallel>, #tpu.dimension_semantics<parallel>], iteration_bounds = array<i64: 1, 2>, scalar_prefetch = 0 : i64, scratch_operands = 0 : i64, tpu.core_type = #tpu.core_type<tc>, window_params = [{transform_indices = @transform_0, window_bounds = array<i64: 8, 128>}, {transform_indices = @transform_1, window_bounds = array<i64: 1, 8, 128>}]} {
    %c0 = arith.constant 0 : index
    %c0_0 = arith.constant 0 : index
    %0 = vector.load %arg2[%c0, %c0_0] : memref<8x128xf32, #tpu.memory_space<vmem>>, vector<8x128xf32>
    %c0_1 = arith.constant 0 : index
    %c0_2 = arith.constant 0 : index
    %c0_3 = arith.constant 0 : index
    %1 = vector.load %arg3[%c0_1, %c0_2, %c0_3] : memref<1x8x128xf32, #tpu.memory_space<vmem>>, vector<1x8x128xf32>
    %2 = vector.shape_cast %1 : vector<1x8x128xf32> to vector<8x128xf32>
    %3 = vector.shape_cast %0 : vector<8x128xf32> to vector<1x8x128xf32>
    tpu.vector_store %arg3[%c0_1, %c0_2, %c0_3], %3 {strides = array<i32>} : memref<1x8x128xf32, #tpu.memory_space<vmem>>, vector<1x8x128xf32>,
    return
  }
  func.func @transform_0(%arg0: i32, %arg1: i32) -> (i32, i32) {
    %c0_i32 = arith.constant 0 : i32
    %c0_i32_0 = arith.constant 0 : i32
    return %arg0, %c0_i32 : i32, i32
  }
  func.func @transform_1(%arg0: i32, %arg1: i32) -> (i32, i32, i32) {
    %c0_i32 = arith.constant 0 : i32
    %c0_i32_0 = arith.constant 0 : i32
    return %arg1, %arg0, %c0_i32 : i32, i32, i32
  }
}

</mosaic_0001>

<bundles_post_ra>
// kernel: tpu_custom_call.1
= control target key start
LH: loop header
LB: loop body
LE: loop exit
PB: predicated region body
PF: predicated region fallthrough
CT: control target
= control target key end

     0   :  { %6 = vsyncpa [#allocation3], 0  ;;  %s565_s0 = inlined_call_operand.hbm [shape: f32[64,128], index: 0, kind: input, shape index: {}]   ;;  %s566_s1 = inlined_call_operand.hbm [shape: f32[2,8,128], index: 1, kind: output, shape index: {}]  }
   0x1   :  { %7 = vsyncpa [#allocation4], 0 }
   0x2   :  { %9 = vsyncpa [#allocation4 + $0x1], 0  ;;  %s417_s6 = smov 0   ;;  %s419_s7 = smov 0  }
   0x3   :  { %s421_s8 = smov 0   ;;  %s423_s9 = smov 0  }
   0x4   :  { %s425_s10 = smov 0   ;;  %s427_s11 = smov 0  }
   0x5 LB: > { %s216_s12 = sadd.s32 4294967295, %s403_s11   ;;  %s217_s13 = sadd.s32 4294967294, %s403_s11   ;;  %s403_s11 = sphi %s427_s11, %s15_s11   ;;  %s399_s10 = sphi %s425_s10, %s584_s10   ;;  %s395_s9 = sphi %s423_s9, %s583_s9   ;;  %s391_s8 = sphi %s421_s8, %s582_s8   ;;  %s387_s7 = sphi %s419_s7, %s581_s7   ;;  %s383_s6 = sphi %s417_s6, %s580_s6  }
   0x6   : > { %s24_s14 = sadd.s32 1, %s399_s10  ;;  %s62_s15 = sadd.s32 1, %s391_s8 }
   0x7   : > { %p25_p0 = scmp.ge.s32.totalorder %s24_s14, 2  ;;  %p72_p1 = scmp.ne.s32.totalorder %s391_s8, %s387_s7 }
   0x8   : > { %p73_p2 = scmp.eq.s32.totalorder %s216_s12, 1  ;;  %p78_p3 = scmp.ne.s32.totalorder %s387_s7, %s383_s6 }
   0x9   : > { %s586_s14 = smov (%p25_p0, %s24_s14), 0  ;;  %p79_p5 = scmp.eq.s32.totalorder %s217_s13, 1 }
   0xa   : > { %p457_p4 = por %p73_p2, %p72_p1  ;;  %s57_s17 = ssub.s32 %s399_s10, %s586_s14 }
   0xb   : > { %p218_p6 = scmp.ge.s32.totalorder %s403_s11, 1  ;;  %p60_p7 = scmp.eq.s32.totalorder %s57_s17, 0 }
   0xc   : > { %s571_s16 = scalar_select %p457_p4, 1, 0 }
   0xd   : > { %p464_p8 = por %p79_p5, %p78_p3  ;;  %p86_p9 = scmp.lt.s32.totalorder %s403_s11, 3 }
   0xe   : > { %s470_s19 = scalar_select %p60_p7, %s391_s8, %s62_s15  }
   0xf   : > { %s572_s18 = scalar_select %p464_p8, 1, 0 }
  0x10   : > { %p472_p10 = pnand %p218_p6, %p86_p9  ;;  %p476_p11 = scmp.eq.s32.totalorder %s216_s12, 0 }
  0x11   : > { %s405_s22 = smov [#allocation2]   ;;  %s293_s27 = scalar_lea.hbm %s565_s0, 128 }
  0x12   : > { %s573_s20 = scalar_select %p472_p10, 1, 0 }
  0x13   : > { %s574_s21 = scalar_select %p476_p11, 1, 0 }
  0x14   : > { %p233_p12 = pneg %p472_p10  ;;  %s101_s23 = sshll.u32 %s405_s22, 4  ;;  %s102_s23 = int_to_ptr.vmem [resolvable:$true] %s101_s23 }
  0x15   : > { %p294_p0 = scmp.ne.s32.totalorder %s565_s0, %s293_s27  ;;  %s298_s3 = scalar_lea.hbm %s565_s0, 1024 }
  0x16   : > { %p484_p13 = pnand %p476_p11, %p233_p12  ;;  %p299_p5 = scmp.lt.u32.totalorder %s298_s3, %s293_s27 }
  0x17   : > { %p300_p6 = scmp.lt.u32.totalorder %s293_s27, %s565_s0 }
  0x18   : > { %p295_p1 = pneg %p484_p13 }
  0x19   : > { %p301_p7 = por %p300_p6, %p299_p5 }
  0x1a   : > { %p296_p2 = pnand %p295_p1, %p294_p0 }
  0x1c   : > { %p297_p3 = pneg %p296_p2 }
  0x1e   : > { %p302_p9 = pnand %p301_p7, %p297_p3 }
  0x20   : > { %305 = shalt.err (!%p302_p9)
}
  0x21   : > { %s306_s12 = scalar_lea.vmem %s102_s23, 128  ;;  %p314_p11 = scmp.lt.s32.totalorder %s102_s23, %s102_s23 }
  0x22   : > { %p307_p12 = scmp.ne.s32.totalorder %s102_s23, %s306_s12  ;;  %p315_p10 = scmp.lt.s32.totalorder %s306_s12, %s306_s12 }
  0x24   : > { %p309_p8 = pnand %p307_p12, %p295_p1  ;;  %p316_p0 = por %p315_p10, %p314_p11 }
  0x26   : > { %p310_p4 = pneg %p309_p8 }
  0x28   : > { %p317_p2 = pnand %p316_p0, %p310_p4 }
  0x2a   : > { %320 = shalt.err (!%p317_p2)
}
  0x2b   : > { %236 = dma.hbm_to_vmem [thread:$0]  (!%p484_p13), %s565_s0, 128, %s102_s23, [#allocation3]  }
  0x2c   : > { %p576_p5 = scmp.ne.s32.totalorder %s573_s20, 0 }
  0x2d   : > { %p577_p3 = scmp.ne.s32.totalorder (!%p576_p5), %s574_s21, 0 }
  0x2e   : > { %114 = sbr.rel (%p576_p5) target bundleno = 80 (0x50), region = 24 }
  0x35   : > { %374 = dma.done.wait (%p577_p3), [#allocation3], 128  }
  0x36   : > { %376 = vsyncadd (%p577_p3), [#allocation3], 4294967168  ;;  %s126_s17 = sand.u32 1, %s387_s7   ;;  %s224_s26 = sshll.u32 %s395_s9, 7  ;;  %v129_v0 = vld [vmem:[#allocation2] sm:$0xff] }
  0x37   : > { %s222_s22 = sshll.u32 %s126_s17, 3  ;;  %s520_s20 = scalar_lea.hbm %s566_s1, %s224_s26 }
  0x38   : > { %s128_s25 = scalar_lea.vmem [#allocation5], %s222_s22  ;;  %s132_s21 = scalar_lea.sflag [#allocation4], %s126_s17 }
  0x39   : > { %s146_s24 = sshll.u32 %s128_s25, 4  ;;  %130 = vst [vmem:[%s128_s25] sm:$0xff] %v129_v0  ;;  %p578_p8 = scmp.ne.s32.totalorder %s571_s16, 0  ;;  %s515_s24 = int_to_ptr.vmem [resolvable:$true] %s146_s24 }
  0x3a   : > { %s321_s28 = scalar_lea.vmem %s515_s24, 128  ;;  %s406_s29 = smov [#allocation5]  }
  0x3b   : > { %p322_p4 = scmp.ne.s32.totalorder %s515_s24, %s321_s28  ;;  %s325_s9 = sshll.u32 %s406_s29, 4  ;;  %s326_s9 = int_to_ptr.vmem [resolvable:$false] %s325_s9 }
  0x3c   : > { %s327_s30 = scalar_lea.vmem %s326_s9, 256  ;;  %p328_p13 = scmp.lt.s32.totalorder %s515_s24, %s326_s9 }
  0x3d   : > { %p323_p10 = pnand %p322_p4, %p578_p8  ;;  %p329_p1 = scmp.lt.s32.totalorder %s327_s30, %s321_s28 }
  0x3f   : > { %p324_p11 = pneg %p323_p10  ;;  %p330_p6 = por %p329_p1, %p328_p13 }
  0x41   : > { %p331_p7 = pnand %p330_p6, %p324_p11 }
  0x43   : > { %334 = shalt.err (!%p331_p7)
}
  0x44   : > { %s335_s2 = scalar_lea.hbm %s520_s20, 128  ;;  %s339_s5 = scalar_lea.hbm %s566_s1, 256 }
  0x45   : > { %p336_p9 = scmp.ne.s32.totalorder %s520_s20, %s335_s2  ;;  %p340_p2 = scmp.lt.u32.totalorder %s520_s20, %s566_s1 }
  0x46   : > { %p341_p5 = scmp.lt.u32.totalorder %s339_s5, %s335_s2  ;;  %p343_p4 = scmp.lt.u32.totalorder %s335_s2, %s520_s20 }
  0x47   : > { %p337_p12 = pnand %p336_p9, %p578_p8 }
  0x48   : > { %p342_p3 = por %p341_p5, %p340_p2 }
  0x49   : > { %p338_p0 = pneg %p337_p12 }
  0x4a   : > { %p344_p10 = por %p343_p4, %p342_p3 }
  0x4c   : > { %p345_p11 = pnand %p344_p10, %p338_p0 }
  0x4e   : > { %348 = shalt.err (!%p345_p11)
}
  0x4f   : > { %231 = dma.vmem_to_hbm [thread:$0]  (%p578_p8), %s515_s24, 128, %s520_s20, %s132_s21  }
  0x50 PF: > { %p243_p13 = scmp.ge.s32.totalorder %s403_s11, 2  ;;  %s158_s15 = sand.u32 1, %s383_s6  }
  0x51   : > { %p579_p1 = scmp.ne.s32.totalorder %s572_s18, 0  ;;  %s159_s17 = scalar_lea.sflag [#allocation4], %s158_s15 }
  0x53   : > { %p238_p6 = pnand %p243_p13, %p579_p1 }
  0x55   : > { %378 = dma.done.wait (!%p238_p6), %s159_s17, 128  }
  0x56   : > { %380 = vsyncadd (!%p238_p6), %s159_s17, 4294967168  ;;  %s15_s11 = sadd.s32 1, %s403_s11   ;;  %s580_s6 = smov %s387_s7 }
  0x57   : > { %p12_p7 = scmp.ge.s32.totalorder %s15_s11, 4   ;;  %s581_s7 = smov %s391_s8 }
  0x58   : > { %s582_s8 = smov %s470_s19  ;;  %s583_s9 = smov %s399_s10 }
  0x59   : > { %s584_s10 = smov %s586_s14  ;;  %14 = sbr.rel (!%p12_p7) target bundleno = 5 (0x5), region = 62 }
  0x60   :  { %164 = vsyncpa [#allocation3], 1 }
  0x61   :  { %166 = vsyncpa [#allocation3 + $0x1], 1 }
  0x62   :  { %167 = vsyncpa [#allocation4], 1 }
  0x63   :  { %169 = vsyncpa [#allocation4 + $0x1], 1 }

</bundles_post_ra>
